<compile_context>
chip_gen: v7x
topology: tpu7x:2x2x1
jax: 0.10.0
libtpu: 0.0.40
codegen_flags: <defaults>
</compile_context>

<pallas_src>
import functools

import numpy as np
import jax
import jax.numpy as jnp
from jax import lax
from jax.experimental import pallas as pl
from jax.experimental.pallas import tpu as pltpu

LANE = 128        # TPU lane width
NODE_TILE = 128   # nodes per packed block (several graphs share one tile)


def _round_up(x, m):
    return ((x + m - 1) // m) * m


# --------------------------------------------------------------------------------
# Pallas kernel: one grid step processes ONE packed 128-node block (holding several
# graphs block-diagonally).
#   a_ref    : [NP, NP]   bf16  (A + I) for this block — exact small integers
#   x_ref    : [NP, Fp]   f32   packed node features (zero on padded rows)
#   dinv_ref : [NP, 1]    f32   D^-1/2 per node (0 on padded rows)
#   pd_ref   : [GPB, NP]  f32   mean-pool matrix pre-scaled by D^-1/2 (P * dinv)
#   w1: [Fp, H] f32, b1: [1, H] f32, w2: [H, Cp] f32, b2: [1, Cp] f32
#   o_ref    : [GPB, Cp]  f32   per-graph-slot log-probabilities
# --------------------------------------------------------------------------------
def gnn_kernel(a_ref, x_ref, dinv_ref, pd_ref, w1_ref, b1_ref, w2_ref, b2_ref,
               o_ref, *, num_classes):
    a = a_ref[...]                       # [NP, NP] bf16 (exact integer entries)
    dinv = dinv_ref[...]                 # [NP, 1]  f32

    # ---- Layer 1: h1 = relu(D^-1/2 (A+I) D^-1/2 (X W1) + b1) --------------------
    xw1 = jnp.dot(x_ref[...], w1_ref[...],
                  preferred_element_type=jnp.float32)                      # [NP, H]
    ax = jnp.dot(a, (dinv * xw1).astype(jnp.bfloat16),
                 preferred_element_type=jnp.float32)                        # [NP, H]
    h1 = jnp.maximum(dinv * ax + b1_ref[...], 0.0)                          # [NP, H]

    # ---- Layer 2 folded with global_mean_pool:
    #   pooled = P @ (A_hat @ (h1 W2)) + b2
    #          = ((P D^-1/2) (A+I)) @ (D^-1/2 h1) @ W2 + b2
    # (valid because each pool row of P sums to 1 over its graph's nodes)
    pa = jnp.dot(pd_ref[...], a.astype(jnp.float32),
                 preferred_element_type=jnp.float32)                        # [GPB, NP]
    ph = jnp.dot(pa, dinv * h1, preferred_element_type=jnp.float32)         # [GPB, H]
    pooled = jnp.dot(ph, w2_ref[...],
                     preferred_element_type=jnp.float32) + b2_ref[...]      # [GPB, Cp]

    # ---- log_softmax over the real classes only (padded lanes masked) ----------
    col = lax.broadcasted_iota(jnp.int32, pooled.shape, 1)
    logits = jnp.where(col < num_classes, pooled, jnp.float32(-1e30))
    m = jnp.max(logits, axis=1, keepdims=True)
    z = logits - m
    lse = jnp.log(jnp.sum(jnp.exp(z), axis=1, keepdims=True))
    o_ref[...] = (z - lse).astype(o_ref.dtype)


# --------------------------------------------------------------------------------
# pallas_call wrapper (inputs already packed / padded / cast).
# --------------------------------------------------------------------------------
def gcn_pallas(a_g, x_g, dinv_g, pd_g, w1, b1, w2, b2, *, num_classes):
    nb, n_p, _ = a_g.shape
    f_p = x_g.shape[2]
    gpb = pd_g.shape[1]
    hid = w1.shape[1]
    c_p = w2.shape[1]

    flops = 2 * nb * (n_p * f_p * hid + n_p * n_p * hid + gpb * n_p * n_p
                      + gpb * n_p * hid + gpb * hid * c_p)
    bytes_accessed = (a_g.nbytes + x_g.nbytes + dinv_g.nbytes + pd_g.nbytes
                      + w1.nbytes + b1.nbytes + w2.nbytes + b2.nbytes
                      + nb * gpb * c_p * 4)

    grid_spec = pltpu.PrefetchScalarGridSpec(
        num_scalar_prefetch=0,
        grid=(nb,),
        in_specs=[
            pl.BlockSpec((None, n_p, n_p), lambda i: (i, 0, 0)),   # (A+I) block, bf16
            pl.BlockSpec((None, n_p, f_p), lambda i: (i, 0, 0)),   # X block
            pl.BlockSpec((None, n_p, 1), lambda i: (i, 0, 0)),     # D^-1/2 column
            pl.BlockSpec((None, gpb, n_p), lambda i: (i, 0, 0)),   # P * D^-1/2
            pl.BlockSpec((f_p, hid), lambda i: (0, 0)),            # W1 (resident)
            pl.BlockSpec((1, hid), lambda i: (0, 0)),              # b1
            pl.BlockSpec((hid, c_p), lambda i: (0, 0)),            # W2
            pl.BlockSpec((1, c_p), lambda i: (0, 0)),              # b2
        ],
        out_specs=pl.BlockSpec((None, gpb, c_p), lambda i: (i, 0, 0)),  # (8k,128) tile
    )

    return pl.pallas_call(
        functools.partial(gnn_kernel, num_classes=num_classes),
        out_shape=jax.ShapeDtypeStruct((nb, gpb, c_p), jnp.float32),
        grid_spec=grid_spec,
        compiler_params=pltpu.CompilerParams(
            # Block axis is fully independent -> split across v7x's 2 TensorCores.
            dimension_semantics=("parallel",),
            # Per-step working set is ~100 KiB; 32 MiB fits every generation
            # (well under v7x's 64 MiB physical VMEM) with ample pipelining room.
            vmem_limit_bytes=32 * 1024 * 1024,
        ),
        cost_estimate=pl.CostEstimate(
            flops=int(flops),
            transcendentals=int(nb * gpb * (c_p + 1)),
            bytes_accessed=int(bytes_accessed),
        ),
    )(a_g, x_g, dinv_g, pd_g, w1, b1, w2, b2)


# --------------------------------------------------------------------------------
# Plain-JAX / numpy glue: pack graphs into 128-node blocks, build per-block dense
# (A+I), features, dinv and pre-scaled pool matrix, call the kernel, un-pack.
# --------------------------------------------------------------------------------
def gnn_forward(x, edge_index, batch, w1, b1, w2, b2, *, num_graphs,
                node_tile=NODE_TILE):
    n_nodes, n_feat = x.shape
    num_classes = w2.shape[1]

    # ---- Host-side first-fit packing of graphs into node_tile-node blocks -------
    batch_np = np.asarray(batch)
    sizes = np.bincount(batch_np, minlength=num_graphs).astype(np.int64)
    assert int(sizes.max()) <= node_tile, (
        "a single graph exceeds the node tile; raise node_tile")
    starts = np.concatenate([[0], np.cumsum(sizes)[:-1]])

    block_of = np.zeros(num_graphs, np.int32)   # block id of each graph
    row_off = np.zeros(num_graphs, np.int32)    # node offset of graph inside block
    slot_of = np.zeros(num_graphs, np.int32)    # pool slot of graph inside block
    cur_blk, cur_off, cur_slot = 0, 0, 0
    for g in range(num_graphs):
        s = int(sizes[g])
        if cur_off + s > node_tile:
            cur_blk += 1
            cur_off = 0
            cur_slot = 0
        block_of[g] = cur_blk
        row_off[g] = cur_off
        slot_of[g] = cur_slot
        cur_off += s
        cur_slot += 1
    num_blocks = cur_blk + 1
    gpb = _round_up(int(np.max(slot_of)) + 1, 8)   # graph slots per block (sublane pad)

    # ---- Per-node placement (block, row-in-block) --------------------------------
    local = (np.arange(n_nodes, dtype=np.int64) - starts[batch_np]).astype(np.int32)
    node_blk = jnp.asarray(block_of[batch_np])
    node_row = jnp.asarray(row_off[batch_np] + local)
    node_slot = jnp.asarray(slot_of[batch_np])

    # ---- Packed block-diagonal (A + I): exact small integers, shipped as bf16 ----
    src, dst = edge_index[0], edge_index[1]
    a = jnp.zeros((num_blocks, node_tile, node_tile), jnp.float32)
    a = a.at[node_blk[dst], node_row[dst], node_row[src]].add(1.0)  # aggregate at target
    a = a.at[node_blk, node_row, node_row].add(1.0)                 # self loops, real nodes
    deg = jnp.sum(a, axis=2)                                        # [NB, NP]
    dinv = jnp.where(deg > 0, lax.rsqrt(deg), 0.0)                  # [NB, NP] f32

    # ---- Packed node features (feature dim padded to a multiple of 8) ------------
    f_pad = _round_up(max(n_feat, 8), 8)
    x_pad = jnp.pad(x.astype(jnp.float32), ((0, 0), (0, f_pad - n_feat)))
    x_g = jnp.zeros((num_blocks, node_tile, f_pad), jnp.float32)
    x_g = x_g.at[node_blk, node_row].set(x_pad)

    # ---- Mean-pool matrix pre-scaled by D^-1/2: pd[b, slot, row] = dinv/|graph| ---
    inv_cnt = 1.0 / jnp.maximum(jnp.asarray(sizes, jnp.float32), 1.0)
    p = jnp.zeros((num_blocks, gpb, node_tile), jnp.float32)
    p = p.at[node_blk, node_slot, node_row].set(inv_cnt[batch])
    pd = p * dinv[:, None, :]

    # ---- Parameters: hidden stays at its natural width; classes lane-padded ------
    c_pad = _round_up(num_classes, LANE)
    w1_p = jnp.pad(w1, ((0, f_pad - n_feat), (0, 0)))
    b1_p = b1.reshape(1, -1)
    w2_p = jnp.pad(w2, ((0, 0), (0, c_pad - num_classes)))
    b2_p = jnp.pad(b2.reshape(1, -1), ((0, 0), (0, c_pad - num_classes)))

    out = gcn_pallas(a.astype(jnp.bfloat16),      # integer entries -> exact in bf16
                     x_g,
                     dinv[:, :, None],
                     pd,
                     w1_p, b1_p, w2_p, b2_p,
                     num_classes=num_classes)

    # Un-pack: (block, slot) -> graph rows.
    flat = out.reshape(num_blocks * gpb, c_pad)
    idx = jnp.asarray(block_of.astype(np.int64) * gpb + slot_of.astype(np.int64))
    return flat[idx, :num_classes]


# --------------------------------------------------------------------------------
# Pure-JAX reference (dense, f32) for correctness checking.
# --------------------------------------------------------------------------------
def gnn_reference(x, edge_index, batch, w1, b1, w2, b2, num_graphs):
    n = x.shape[0]
    src, dst = edge_index[0], edge_index[1]
    a = jnp.zeros((n, n), jnp.float32).at[dst, src].add(1.0)
    a = a + jnp.eye(n, dtype=jnp.float32)
    deg = jnp.sum(a, axis=1)
    dinv = jnp.where(deg > 0, lax.rsqrt(deg), 0.0)
    a_hat = dinv[:, None] * a * dinv[None, :]
    h = jnp.maximum(a_hat @ (x @ w1) + b1[None, :], 0.0)
    h = a_hat @ (h @ w2) + b2[None, :]
    onehot = (batch[None, :] == jnp.arange(num_graphs)[:, None]).astype(jnp.float32)
    pooled = (onehot @ h) / jnp.maximum(jnp.sum(onehot, axis=1, keepdims=True), 1.0)
    return jax.nn.log_softmax(pooled, axis=1)


def glorot(key, shape):
    fan_in, fan_out = shape
    limit = (6.0 / (fan_in + fan_out)) ** 0.5
    return jax.random.uniform(key, shape, jnp.float32, -limit, limit)


if __name__ == "__main__":
    # Module config: num_node_features = 1, hidden = 16, num_classes = 4.
    num_node_features = 1
    hidden = 16
    num_classes = 4

    # A batch of chain graphs with varying sizes (exercises packing + mean pool).
    graph_sizes = [12, 9, 15, 10, 7, 13, 11, 8, 14, 6,
                   12, 10, 9, 16, 11, 7, 13, 10, 8, 12, 9, 14]
    num_graphs = len(graph_sizes)
    num_nodes = sum(graph_sizes)

    key = jax.random.PRNGKey(0)
    kx, kw1, kw2 = jax.random.split(key, 3)

    x = jax.random.normal(kx, (num_nodes, num_node_features), jnp.float32)

    src_list, dst_list, batch_list = [], [], []
    offset = 0
    for g, n in enumerate(graph_sizes):
        for i in range(n - 1):
            src_list += [offset + i, offset + i + 1]
            dst_list += [offset + i + 1, offset + i]
        batch_list += [g] * n
        offset += n
    edge_index = jnp.array([src_list, dst_list], dtype=jnp.int32)   # [2, E]
    batch = jnp.array(batch_list, dtype=jnp.int32)                  # [N]

    # GCNConv parameters: glorot weights, zero biases (PyG defaults).
    w1 = glorot(kw1, (num_node_features, hidden))
    b1 = jnp.zeros((hidden,), jnp.float32)
    w2 = glorot(kw2, (hidden, num_classes))
    b2 = jnp.zeros((num_classes,), jnp.float32)

    out = gnn_forward(x, edge_index, batch, w1, b1, w2, b2, num_graphs=num_graphs)
    out = jax.block_until_ready(out)

    ref = gnn_reference(x, edge_index, batch, w1, b1, w2, b2, num_graphs)

    assert out.shape == (num_graphs, num_classes)
    assert bool(jnp.all(jnp.isfinite(out)))
    assert bool(jnp.allclose(jnp.sum(jnp.exp(out), axis=1), 1.0, atol=1e-4))
    assert bool(jnp.allclose(out, ref, atol=5e-2, rtol=5e-2))

    print("KERNEL_OK")
</pallas_src>

<mosaic_0001>
module attributes {stable_mosaic.version = 11 : i64} {
  func.func @gnn_kernel(%arg0: i32, %arg1: memref<1x128x128xbf16, #tpu.memory_space<vmem>>, %arg2: memref<1x128x8xf32, #tpu.memory_space<vmem>>, %arg3: memref<1x128x1xf32, #tpu.memory_space<vmem>>, %arg4: memref<1x16x128xf32, #tpu.memory_space<vmem>>, %arg5: memref<8x16xf32, #tpu.memory_space<vmem>>, %arg6: memref<1x16xf32, #tpu.memory_space<vmem>>, %arg7: memref<16x128xf32, #tpu.memory_space<vmem>>, %arg8: memref<1x128xf32, #tpu.memory_space<vmem>>, %arg9: memref<1x16x128xf32, #tpu.memory_space<vmem>>) attributes {dimension_semantics = [#tpu.dimension_semantics<parallel>], iteration_bounds = array<i64: 2>, scalar_prefetch = 0 : i64, scratch_operands = 0 : i64, tpu.core_type = #tpu.core_type<tc>, window_params = [{transform_indices = @transform_0, window_bounds = array<i64: 1, 128, 128>}, {transform_indices = @transform_1, window_bounds = array<i64: 1, 128, 8>}, {transform_indices = @transform_2, window_bounds = array<i64: 1, 128, 1>}, {transform_indices = @transform_3, window_bounds = array<i64: 1, 16, 128>}, {pipeline_mode = #tpu.pipeline_mode<synchronous>, transform_indices = @transform_4, window_bounds = array<i64: 8, 16>}, {pipeline_mode = #tpu.pipeline_mode<synchronous>, transform_indices = @transform_5, window_bounds = array<i64: 1, 16>}, {pipeline_mode = #tpu.pipeline_mode<synchronous>, transform_indices = @transform_6, window_bounds = array<i64: 16, 128>}, {pipeline_mode = #tpu.pipeline_mode<synchronous>, transform_indices = @transform_7, window_bounds = array<i64: 1, 128>}, {transform_indices = @transform_8, window_bounds = array<i64: 1, 16, 128>}]} {
    %c0 = arith.constant 0 : index
    %c0_0 = arith.constant 0 : index
    %c0_1 = arith.constant 0 : index
    %0 = vector.load %arg1[%c0, %c0_0, %c0_1] : memref<1x128x128xbf16, #tpu.memory_space<vmem>>, vector<1x128x128xbf16>
    %1 = vector.shape_cast %0 : vector<1x128x128xbf16> to vector<128x128xbf16>
    %c0_2 = arith.constant 0 : index
    %c0_3 = arith.constant 0 : index
    %c0_4 = arith.constant 0 : index
    %2 = vector.load %arg3[%c0_2, %c0_3, %c0_4] : memref<1x128x1xf32, #tpu.memory_space<vmem>>, vector<1x128x1xf32>
    %3 = vector.shape_cast %2 : vector<1x128x1xf32> to vector<128x1xf32>
    %c0_5 = arith.constant 0 : index
    %c0_6 = arith.constant 0 : index
    %c0_7 = arith.constant 0 : index
    %4 = vector.load %arg2[%c0_5, %c0_6, %c0_7] : memref<1x128x8xf32, #tpu.memory_space<vmem>>, vector<1x128x8xf32>
    %5 = vector.shape_cast %4 : vector<1x128x8xf32> to vector<128x8xf32>
    %c0_8 = arith.constant 0 : index
    %c0_9 = arith.constant 0 : index
    %6 = vector.load %arg5[%c0_8, %c0_9] : memref<8x16xf32, #tpu.memory_space<vmem>>, vector<8x16xf32>
    %cst = arith.constant dense<0.000000e+00> : vector<128x16xf32>
    %7 = tpu.matmul %5, %6, %cst {dimension_numbers = #tpu.dot_dimension_numbers<[1], [0], [0], [1], [0, 0, 1, 1], [], []>} : vector<128x8xf32>, vector<8x16xf32>, vector<128x16xf32> -> vector<128x16xf32>
    %8 = vector.broadcast %3 : vector<128x1xf32> to vector<128x16xf32>
    %9 = arith.mulf %8, %7 : vector<128x16xf32>
    %10 = arith.truncf %9 : vector<128x16xf32> to vector<128x16xbf16>
    %cst_10 = arith.constant dense<0.000000e+00> : vector<128x16xf32>
    %11 = tpu.matmul %1, %10, %cst_10 {dimension_numbers = #tpu.dot_dimension_numbers<[1], [0], [0], [1], [0, 0, 1, 1], [], []>} : vector<128x128xbf16>, vector<128x16xbf16>, vector<128x16xf32> -> vector<128x16xf32>
    %12 = vector.broadcast %3 : vector<128x1xf32> to vector<128x16xf32>
    %13 = arith.mulf %12, %11 : vector<128x16xf32>
    %c0_11 = arith.constant 0 : index
    %c0_12 = arith.constant 0 : index
    %14 = vector.load %arg6[%c0_11, %c0_12] : memref<1x16xf32, #tpu.memory_space<vmem>>, vector<1x16xf32>
    %15 = vector.broadcast %14 : vector<1x16xf32> to vector<128x16xf32>
    %16 = arith.addf %13, %15 : vector<128x16xf32>
    %cst_13 = arith.constant 0.000000e+00 : f32
    %17 = vector.broadcast %cst_13 : f32 to vector<128x16xf32>
    %18 = arith.maximumf %16, %17 : vector<128x16xf32>
    %c0_14 = arith.constant 0 : index
    %c0_15 = arith.constant 0 : index
    %c0_16 = arith.constant 0 : index
    %19 = vector.load %arg4[%c0_14, %c0_15, %c0_16] : memref<1x16x128xf32, #tpu.memory_space<vmem>>, vector<1x16x128xf32>
    %20 = vector.shape_cast %19 : vector<1x16x128xf32> to vector<16x128xf32>
    %21 = arith.extf %1 : vector<128x128xbf16> to vector<128x128xf32>
    %cst_17 = arith.constant dense<0.000000e+00> : vector<16x128xf32>
    %22 = tpu.matmul %20, %21, %cst_17 {dimension_numbers = #tpu.dot_dimension_numbers<[1], [0], [0], [1], [0, 0, 1, 1], [], []>} : vector<16x128xf32>, vector<128x128xf32>, vector<16x128xf32> -> vector<16x128xf32>
    %23 = vector.broadcast %3 : vector<128x1xf32> to vector<128x16xf32>
    %24 = arith.mulf %23, %18 : vector<128x16xf32>
    %cst_18 = arith.constant dense<0.000000e+00> : vector<16x16xf32>
    %25 = tpu.matmul %22, %24, %cst_18 {dimension_numbers = #tpu.dot_dimension_numbers<[1], [0], [0], [1], [0, 0, 1, 1], [], []>} : vector<16x128xf32>, vector<128x16xf32>, vector<16x16xf32> -> vector<16x16xf32>
    %c0_19 = arith.constant 0 : index
    %c0_20 = arith.constant 0 : index
    %26 = vector.load %arg7[%c0_19, %c0_20] : memref<16x128xf32, #tpu.memory_space<vmem>>, vector<16x128xf32>
    %cst_21 = arith.constant dense<0.000000e+00> : vector<16x128xf32>
    %27 = tpu.matmul %25, %26, %cst_21 {dimension_numbers = #tpu.dot_dimension_numbers<[1], [0], [0], [1], [0, 0, 1, 1], [], []>} : vector<16x16xf32>, vector<16x128xf32>, vector<16x128xf32> -> vector<16x128xf32>
    %c0_22 = arith.constant 0 : index
    %c0_23 = arith.constant 0 : index
    %28 = vector.load %arg8[%c0_22, %c0_23] : memref<1x128xf32, #tpu.memory_space<vmem>>, vector<1x128xf32>
    %29 = vector.broadcast %28 : vector<1x128xf32> to vector<16x128xf32>
    %30 = arith.addf %27, %29 : vector<16x128xf32>
    %31 = tpu.iota {dimensions = array<i32: 1>} : vector<16x128xi32>
    %c4_i32 = arith.constant 4 : i32
    %32 = vector.broadcast %c4_i32 : i32 to vector<16x128xi32>
    %33 = arith.cmpi slt, %31, %32 : vector<16x128xi32>
    %cst_24 = arith.constant -1.000000e+30 : f32
    %34 = vector.broadcast %cst_24 : f32 to vector<16x128xf32>
    %35 = arith.select %33, %30, %34 : vector<16x128xi1>, vector<16x128xf32>
    %cst_25 = arith.constant dense<0xFF800000> : vector<16xf32>
    %36 = vector.multi_reduction <maximumf>, %35, %cst_25 [1] : vector<16x128xf32> to vector<16xf32>
    %37 = vector.shape_cast %36 : vector<16xf32> to vector<16x1xf32>
    %38 = vector.broadcast %37 : vector<16x1xf32> to vector<16x128xf32>
    %39 = arith.subf %35, %38 : vector<16x128xf32>
    %40 = math.exp %39 : vector<16x128xf32>
    %cst_26 = arith.constant dense<0.000000e+00> : vector<16xf32>
    %41 = vector.multi_reduction <add>, %40, %cst_26 [1] : vector<16x128xf32> to vector<16xf32>
    %42 = vector.shape_cast %41 : vector<16xf32> to vector<16x1xf32>
    %43 = math.log %42 : vector<16x1xf32>
    %44 = vector.broadcast %43 : vector<16x1xf32> to vector<16x128xf32>
    %45 = arith.subf %39, %44 : vector<16x128xf32>
    %c0_27 = arith.constant 0 : index
    %c0_28 = arith.constant 0 : index
    %c0_29 = arith.constant 0 : index
    %46 = vector.load %arg9[%c0_27, %c0_28, %c0_29] : memref<1x16x128xf32, #tpu.memory_space<vmem>>, vector<1x16x128xf32>
    %47 = vector.shape_cast %46 : vector<1x16x128xf32> to vector<16x128xf32>
    %48 = vector.shape_cast %45 : vector<16x128xf32> to vector<1x16x128xf32>
    tpu.vector_store %arg9[%c0_27, %c0_28, %c0_29], %48 {strides = array<i32>} : memref<1x16x128xf32, #tpu.memory_space<vmem>>, vector<1x16x128xf32>,
    return
  }
  func.func @transform_0(%arg0: i32) -> (i32, i32, i32) {
    %c0_i32 = arith.constant 0 : i32
    %c0_i32_0 = arith.constant 0 : i32
    %c0_i32_1 = arith.constant 0 : i32
    return %arg0, %c0_i32, %c0_i32_0 : i32, i32, i32
  }
  func.func @transform_1(%arg0: i32) -> (i32, i32, i32) {
    %c0_i32 = arith.constant 0 : i32
    %c0_i32_0 = arith.constant 0 : i32
    %c0_i32_1 = arith.constant 0 : i32
    return %arg0, %c0_i32, %c0_i32_0 : i32, i32, i32
  }
  func.func @transform_2(%arg0: i32) -> (i32, i32, i32) {
    %c0_i32 = arith.constant 0 : i32
    %c0_i32_0 = arith.constant 0 : i32
    %c0_i32_1 = arith.constant 0 : i32
    return %arg0, %c0_i32, %c0_i32_0 : i32, i32, i32
  }
  func.func @transform_3(%arg0: i32) -> (i32, i32, i32) {
    %c0_i32 = arith.constant 0 : i32
    %c0_i32_0 = arith.constant 0 : i32
    %c0_i32_1 = arith.constant 0 : i32
    return %arg0, %c0_i32, %c0_i32_0 : i32, i32, i32
  }
  func.func @transform_4(%arg0: i32) -> (i32, i32) {
    %c0_i32 = arith.constant 0 : i32
    %c0_i32_0 = arith.constant 0 : i32
    %c0_i32_1 = arith.constant 0 : i32
    return %c0_i32, %c0_i32_0 : i32, i32
  }
  func.func @transform_5(%arg0: i32) -> (i32, i32) {
    %c0_i32 = arith.constant 0 : i32
    %c0_i32_0 = arith.constant 0 : i32
    %c0_i32_1 = arith.constant 0 : i32
    return %c0_i32, %c0_i32_0 : i32, i32
  }
  func.func @transform_6(%arg0: i32) -> (i32, i32) {
    %c0_i32 = arith.constant 0 : i32
    %c0_i32_0 = arith.constant 0 : i32
    %c0_i32_1 = arith.constant 0 : i32
    return %c0_i32, %c0_i32_0 : i32, i32
  }
  func.func @transform_7(%arg0: i32) -> (i32, i32) {
    %c0_i32 = arith.constant 0 : i32
    %c0_i32_0 = arith.constant 0 : i32
    %c0_i32_1 = arith.constant 0 : i32
    return %c0_i32, %c0_i32_0 : i32, i32
  }
  func.func @transform_8(%arg0: i32) -> (i32, i32, i32) {
    %c0_i32 = arith.constant 0 : i32
    %c0_i32_0 = arith.constant 0 : i32
    %c0_i32_1 = arith.constant 0 : i32
    return %arg0, %c0_i32, %c0_i32_0 : i32, i32, i32
  }
}

</mosaic_0001>

<bundles_post_ra>
// kernel: tpu_custom_call.1
= control target key start
LH: loop header
LB: loop body
LE: loop exit
PB: predicated region body
PF: predicated region fallthrough
CT: control target
= control target key end

     0   :  { %13 = vsyncpa [#allocation3], 0  ;;  %s2162_s0 = inlined_call_operand.vmem [shape: bf16[2,128,128], index: 0, kind: input, shape index: {}]   ;;  %s2163_s1 = inlined_call_operand.vmem [shape: f32[2,128,8], index: 1, kind: input, shape index: {}]   ;;  %s2164_s2 = inlined_call_operand.vmem [shape: f32[2,128,1], index: 2, kind: input, shape index: {}]   ;;  %s2165_s3 = inlined_call_operand.vmem [shape: f32[2,16,128], index: 3, kind: input, shape index: {}]   ;;  %s2166_s4 = inlined_call_operand.vmem [shape: f32[8,16], index: 4, kind: input, shape index: {}]   ;;  %s2167_s5 = inlined_call_operand.vmem [shape: f32[1,16], index: 5, kind: input, shape index: {}]   ;;  %s2168_s6 = inlined_call_operand.vmem [shape: f32[16,128], index: 6, kind: input, shape index: {}]   ;;  %s2169_s7 = inlined_call_operand.vmem [shape: f32[1,128], index: 7, kind: input, shape index: {}]   ;;  %s2170_s8 = inlined_call_operand.hbm [shape: f32[2,16,128], index: 8, kind: output, shape index: {}]  }
   0x1   :  { %15 = vsyncpa [#allocation3 + $0x1], 0  ;;  %s1842_s27 = smov 0   ;;  %s1844_s28 = smov 0  }
   0x2   :  { %s1846_s29 = smov 0   ;;  %s1848_s30 = smov 0  }
   0x3 LB: > { %s1863_s9 = sadd.s32 4294967295, %s1791_s30   ;;  %s1326_s10 = sadd.s32 4294967294, %s1791_s30   ;;  %s1791_s30 = sphi %s1848_s30, %s2176_s30   ;;  %s1787_s29 = sphi %s1846_s29, %s2175_s29   ;;  %s1783_s28 = sphi %s1844_s28, %s2174_s28   ;;  %s1779_s27 = sphi %s1842_s27, %s2173_s27  }
   0x4   : > { %s1867_s11 = sadd.s32 1, %s1791_s30   ;;  %s216_s12 = sadd.s32 1, %s1787_s29 }
   0x5   : > { %s213_s13 = ssub.s32 %s1791_s30, %s1867_s11  ;;  %p226_p0 = scmp.ne.s32.totalorder %s1787_s29, %s1783_s28 }
   0x6   : > { %p214_p1 = scmp.eq.s32.totalorder %s213_s13, 0  ;;  %p227_p2 = scmp.eq.s32.totalorder %s1863_s9, 1 }
   0x7   : > { %p232_p3 = scmp.ne.s32.totalorder %s1783_s28, %s1779_s27  ;;  %p233_p4 = scmp.eq.s32.totalorder %s1326_s10, 1 }
   0x8   : > { %s1878_s14 = scalar_select %p214_p1, %s1787_s29, %s216_s12  }
   0x9   : > { %p1880_p5 = por %p227_p2, %p226_p0  ;;  %p1884_p6 = por %p233_p4, %p232_p3 }
   0xa   : > { %p1329_p7 = scmp.ge.s32.totalorder %s1791_s30, 1  ;;  %p295_p8 = scmp.lt.s32.totalorder %s1791_s30, 3 }
   0xc   : > { %p296_p9 = pnand %p1329_p7, %p295_p8 }
   0xd   : > { %v413_v0 = vld [vmem:[%s2166_s4] sm:$0xff] (!%p296_p9)  ;;  %p344_p10 = scmp.lt.s32.totalorder (!%p296_p9), %s1863_s9, 1  ;;  %v1793_v1 = vmov (!%p296_p9), 0   ;;  %vm414_vm0 = vcmask (!%p296_p9), 64512   ;;  %vm1105_vm1 = vcmask (!%p296_p9), 130048  }
   0xe   : > { %299 = sbr.rel (%p296_p9) target bundleno = 1296 (0x510), region = 52  ;;  %1450 = vmatprep.subr.mxu0 (!%p296_p9), %v413_v0  ;;  %1711 = vset.pattern.permute.xlu0 (!%p296_p9), %v1793_v1 }
   0xf   : > { %1451 = vmatpush3.msra.mxu0 (!%p296_p9), %v413_v0  ;;  %1712 = vset.pattern.permute.xlu1 (!%p296_p9), %v1793_v1 }
  0x15   : > { %s1895_s19 = scalar_select %p344_p10, %s1863_s9, 1 }
  0x17   : > { %s1373_s20 = sshll.u32 %s1895_s19, 7  ;;  %s1372_s10 = sshll.u32 %s1895_s19, 6 }
  0x18   : > { %s1901_s23 = scalar_lea.vmem %s2163_s1, %s1373_s20  ;;  %s1911_s26 = scalar_lea.vmem %s2164_s2, %s1373_s20 }
  0x19   : > { %v397_v2 = vld [vmem:[%s1901_s23] sm:$0xff]  ;;  %v398_v3 = vld [vmem:[%s1901_s23 + $0x8] sm:$0xff]  ;;  %v399_v4 = vld [vmem:[%s1901_s23 + $0x10] sm:$0xff]  ;;  %s348_s17 = scalar_lea.vmem %s2162_s0, %s1372_s10  ;;  %s1375_s18 = sshll.u32 %s1895_s19, 4 }
  0x1a   : > { %1452 = vmatprep.mubr.msk.f32.mxu0 %vm414_vm0, %v397_v2  ;;  %v400_v5 = vld [vmem:[%s1901_s23 + $0x18] sm:$0xff]  ;;  %v401_v6 = vld [vmem:[%s1901_s23 + $0x20] sm:$0xff]  ;;  %v383_v8 = vld [vmem:[%s1911_s26 + $0x10] sm:$0xff]  ;;  %s363_s22 = scalar_lea.vmem %s2165_s3, %s1375_s18 }
  0x1b   : > { %1453 = vmatmul.mubr.msk.f32.vlgmr.msra.gmra.mrb[0].mxu0 %vm414_vm0, %v398_v3  ;;  %v381_v7 = vld [vmem:[%s1911_s26] sm:$0xff]  ;;  %v402_v9 = vld [vmem:[%s1901_s23 + $0x28] sm:$0xff]  ;;  %620 = vperm.xlu1 %1712, %v383_v8   ;;  %v403_v11 = vld [vmem:[%s1901_s23 + $0x30] sm:$0xff] }
  0x1c   : > { %1455 = vmatprep.mubr.msk.f32.mxu0 %vm414_vm0, %v399_v4  ;;  %610 = vperm.xlu0 %1711, %v381_v7   ;;  %v382_v10 = vld [vmem:[%s1911_s26 + $0x8] sm:$0xff]  ;;  %v384_v12 = vld [vmem:[%s1911_s26 + $0x18] sm:$0xff]  ;;  %v385_v14 = vld [vmem:[%s1911_s26 + $0x20] sm:$0xff] }
  0x1d   : > { %v404_v13 = vld [vmem:[%s1901_s23 + $0x38] sm:$0xff]  ;;  %v405_v15 = vld [vmem:[%s1901_s23 + $0x40] sm:$0xff]  ;;  %v386_v16 = vld [vmem:[%s1911_s26 + $0x28] sm:$0xff] }
  0x1e   : > { %v406_v17 = vld [vmem:[%s1901_s23 + $0x48] sm:$0xff]  ;;  %v387_v18 = vld [vmem:[%s1911_s26 + $0x30] sm:$0xff]  ;;  %v388_v20 = vld [vmem:[%s1911_s26 + $0x38] sm:$0xff] }
  0x1f   : > { %1456 = vmatmul.mubr.msk.f32.gmra.mrb[2].mxu0 %vm414_vm0, %v400_v5  ;;  %625 = vperm.xlu1 %1712, %v384_v12   ;;  %v407_v19 = vld [vmem:[%s1901_s23 + $0x50] sm:$0xff]  ;;  %v408_v21 = vld [vmem:[%s1901_s23 + $0x58] sm:$0xff]  ;;  %v389_v22 = vld [vmem:[%s1911_s26 + $0x40] sm:$0xff] }
  0x20   : > { %1458 = vmatprep.mubr.msk.f32.mxu0 %vm414_vm0, %v401_v6  ;;  %615 = vperm.xlu0 %1711, %v382_v10   ;;  %v409_v23 = vld [vmem:[%s1901_s23 + $0x60] sm:$0xff]  ;;  %v390_v24 = vld [vmem:[%s1911_s26 + $0x48] sm:$0xff]  ;;  %v391_v26 = vld [vmem:[%s1911_s26 + $0x50] sm:$0xff] }
  0x21   : > { %v410_v25 = vld [vmem:[%s1901_s23 + $0x68] sm:$0xff]  ;;  %v411_v27 = vld [vmem:[%s1901_s23 + $0x70] sm:$0xff]  ;;  %v392_v28 = vld [vmem:[%s1911_s26 + $0x58] sm:$0xff] }
  0x22   : > { %v412_v29 = vld [vmem:[%s1901_s23 + $0x78] sm:$0xff]  ;;  %v393_v30 = vld [vmem:[%s1911_s26 + $0x60] sm:$0xff]  ;;  %v394_v31 = vld [vmem:[%s1911_s26 + $0x68] sm:$0xff] }
  0x23   : > { %1459 = vmatmul.mubr.msk.f32.gmra.mrb[4].mxu0 %vm414_vm0, %v402_v9  ;;  %635 = vperm.xlu1 %1712, %v386_v16   ;;  %v395_v32 = vld [vmem:[%s1911_s26 + $0x70] sm:$0xff]  ;;  %v396_v33 = vld [vmem:[%s1911_s26 + $0x78] sm:$0xff]  ;;  %v1713_v34 = vld [vmem:[%s348_s17] sm:$0xff]  }
  0x24   : > { %1461 = vmatprep.mubr.msk.f32.mxu0 %vm414_vm0, %v403_v11  ;;  %630 = vperm.xlu0 %1711, %v385_v14   ;;  %v1960_v35 = vld [vmem:[%s348_s17 + $0x8] sm:$0xff]   ;;  %v1963_v36 = vld [vmem:[%s348_s17 + $0x10] sm:$0xff]   ;;  %v1967_v37 = vld [vmem:[%s348_s17 + $0x18] sm:$0xff]  }
  0x25   : > { %1492 = vmatprep.mubr.bf16.mxu1 %v1713_v34  ;;  %1586 = vmatprep.subr.bf16.mxu0 %v1713_v34  ;;  %v1971_v38 = vld [vmem:[%s348_s17 + $0x20] sm:$0xff]   ;;  %v1975_v39 = vld [vmem:[%s348_s17 + $0x28] sm:$0xff]   ;;  %v1979_v40 = vld [vmem:[%s348_s17 + $0x30] sm:$0xff]  }
  0x26   : > { %1588 = vmatpush3.bf16.msra.mxu0 %v1713_v34  ;;  %v1983_v41 = vld [vmem:[%s348_s17 + $0x38] sm:$0xff]   ;;  %v912_v42 = vld [vmem:[%s363_s22] sm:$0xff]  ;;  %v913_v43 = vld [vmem:[%s363_s22 + $0x8] sm:$0xff]  ;;  %s341_s17 = sand.u32 1, %s1783_s28   ;;  %s1376_s22 = sshll.u32 %s1863_s9, 8 }
  0x27   : > { %1462 = vmatmul.mubr.msk.f32.gmra.mrb[6].mxu0 %vm414_vm0, %v404_v13  ;;  %645 = vperm.xlu1 %1712, %v388_v20   ;;  %s1330_s18 = sshll.u32 %s341_s17, 4  ;;  %s2117_s24 = scalar_lea.hbm %s2170_s8, %s1376_s22 }
  0x28   : > { %1464 = vmatprep.mubr.msk.f32.mxu0 %vm414_vm0, %v405_v15  ;;  %640 = vperm.xlu0 %1711, %v387_v18   ;;  %s343_s20 = scalar_lea.vmem [#allocation2], %s1330_s18  ;;  %s2121_s25 = scalar_lea.sflag [#allocation3], %s341_s17 }
  0x29   : > { %1590 = vmatprep.subr.bf16.mxu0 %v1960_v35  ;;  %s1228_s21 = sshll.u32 %s343_s20, 4  ;;  %s1794_s9 = smov [#allocation2]   ;;  %s2119_s21 = int_to_ptr.vmem [resolvable:$true] %s1228_s21 }
  0x2a   : > { %1592 = vmatpush3.bf16.msra.mxu0 %v1960_v35  ;;  %s1729_s26 = scalar_lea.vmem %s2119_s21, 256  ;;  %s1733_s10 = sshll.u32 %s1794_s9, 4  ;;  %s1734_s10 = int_to_ptr.vmem [resolvable:$false] %s1733_s10 }
  0x2b   : > { %1465 = vmatmul.mubr.msk.f32.gmra.mrb[8].mxu0 %vm414_vm0, %v406_v17  ;;  %655 = vperm.xlu1 %1712, %v390_v24   ;;  %p1730_p11 = scmp.ne.s32.totalorder %s2119_s21, %s1729_s26  ;;  %s1735_s12 = scalar_lea.vmem %s1734_s10, 512 }
  0x2c   : > { %1467 = vmatprep.mubr.msk.f32.mxu0 %vm414_vm0, %v407_v19  ;;  %650 = vperm.xlu0 %1711, %v389_v22   ;;  %p1736_p0 = scmp.lt.s32.totalorder %s2119_s21, %s1734_s10  ;;  %p1737_p1 = scmp.lt.s32.totalorder %s1735_s12, %s1729_s26 }
  0x2d   : > { %1594 = vmatprep.subr.bf16.mxu0 %v1963_v36  ;;  %p1731_p12 = pnand %p1730_p11, %p1880_p5 }
  0x2e   : > { %1596 = vmatpush3.bf16.msra.mxu0 %v1963_v36  ;;  %p1738_p2 = por %p1737_p1, %p1736_p0 }
  0x2f   : > { %1468 = vmatmul.mubr.msk.f32.gmra.mrb[10].mxu0 %vm414_vm0, %v408_v21  ;;  %665 = vperm.xlu1 %1712, %v392_v28   ;;  %p1732_p13 = pneg %p1731_p12 }
  0x30   : > { %1470 = vmatprep.mubr.msk.f32.mxu0 %vm414_vm0, %v409_v23  ;;  %660 = vperm.xlu0 %1711, %v391_v26  }
  0x31   : > { %1598 = vmatprep.subr.bf16.mxu0 %v1967_v37  ;;  %p1739_p3 = pnand %p1738_p2, %p1732_p13 }
  0x32   : > { %1600 = vmatpush3.bf16.msra.mxu0 %v1967_v37 }
  0x33   : > { %1471 = vmatmul.mubr.msk.f32.gmra.mrb[12].mxu0 %vm414_vm0, %v410_v25  ;;  %675 = vperm.xlu1 %1712, %v394_v31  }
  0x34   : > { %1473 = vmatprep.mubr.msk.f32.mxu0 %vm414_vm0, %v411_v27  ;;  %670 = vperm.xlu0 %1711, %v393_v30  }
  0x35   : > { %1602 = vmatprep.subr.bf16.mxu0 %v1971_v38 }
  0x36   : > { %1604 = vmatpush3.bf16.msra.mxu0 %v1971_v38 }
  0x37   : > { %1474 = vmatmul.mubr.msk.f32.gmra.mrb[14].mxu0 %vm414_vm0, %v412_v29  ;;  %685 = vperm.xlu1 %1712, %v396_v33  }
  0x38   : > { %680 = vperm.xlu0 %1711, %v395_v32   ;;  %1606 = vmatprep.subr.bf16.mxu0 %v1975_v39 }
  0x39   : > { %1540 = vmatprep.mubr.f32.mxu0 %v912_v42 }
  0x3a   : > { %1608 = vmatpush3.bf16.msra.mxu0 %v1975_v39 }
  0x3b   : > { %1610 = vmatprep.subr.bf16.mxu0 %v1979_v40 }
  0x3e   : > { %1612 = vmatpush3.bf16.msra.mxu0 %v1979_v40 }
  0x3f   : > { %1614 = vmatprep.subr.bf16.mxu0 %v1983_v41 }
  0x42   : > { %1616 = vmatpush3.bf16.msra.mxu0 %v1983_v41 }
  0x45   : > { %1541 = vmatmul.mubr.f32.vlgmr.msra.gmra.mrb[16].mxu0 %v913_v43 }
  0x9a   : > { %v1992_v44 = vpop.permute.xlu1 %620 }
  0x9b   : > { %v1994_v45 = vpop.permute.xlu0 %610 }
  0x9e   : > { %v1996_v46 = vpop.permute.xlu1 %625 }
  0x9f   : > { %v1998_v47 = vpop.permute.xlu0 %615 }
  0xa2   : > { %v2000_v48 = vpop.permute.xlu1 %635 }
  0xa3   : > { %v2002_v49 = vpop.permute.xlu0 %630 }
  0xa6   : > { %v2006_v54 = vpop.permute.xlu1 %645 }
  0xa7   : > { %v2008_v57 = vpop.permute.xlu0 %640 }
  0xaa   : > { %v2013_v1 = vpop.permute.xlu1 %655 }
  0xab   : > { %v2016_v3 = vpop.permute.xlu0 %650 }
  0xae   : > { %v2020_v9 = vpop.permute.xlu1 %665 }
  0xaf   : > { %v2022_v12 = vpop.permute.xlu0 %660 }
  0xb2   : > { %v2027_v20 = vpop.permute.xlu1 %675 }
  0xb3   : > { %v2030_v22 = vpop.permute.xlu0 %670 }
  0xb6   : > { %v2034_v28 = vpop.permute.xlu1 %685 }
  0xb7   : > { %v2036_v31 = vpop.permute.xlu0 %680 }
  0xee   : > { %v1454_v50 = vpop.f32.mrb[0].mxu0 }
  0xef   : > { %v689_v51 = vmul.f32 %v1454_v50, %v1998_v47  ;;  %v529_v52 = vpop.f32.mrb[1].mxu0 }
  0xf0   : > { %v688_v53 = vmul.f32 %v1994_v45, %v529_v52 }
  0xf2   : > { %v1457_v55 = vpop.f32.mrb[2].mxu0  ;;  %v704_v56 = vpack.c.bf16 %v689_v51, %v688_v53 }
  0xf3   : > { %v691_v58 = vmul.f32 %v1457_v55, %v1996_v46  ;;  %v539_v59 = vpop.f32.mrb[3].mxu0 }
  0xf4   : > { %v690_v60 = vmul.f32 %v1992_v44, %v539_v59  ;;  %1476 = vmatprep.subr.bf16.mxu1 %v704_v56 }
  0xf5   : > { %1477 = vmatpush3.bf16.msra.mxu1 %v704_v56 }
  0xf6   : > { %v705_v61 = vpack.c.bf16 %v691_v58, %v690_v60  ;;  %v1460_v62 = vpop.f32.mrb[4].mxu0 }
  0xf7   : > { %v693_v63 = vmul.f32 %v1460_v62, %v2000_v48  ;;  %v549_v0 = vpop.f32.mrb[5].mxu0 }
  0xf8   : > { %v692_v2 = vmul.f32 %v2002_v49, %v549_v0  ;;  %1478 = vmatprep.subr.bf16.mxu1 %v705_v61 }
  0xf9   : > { %1479 = vmatpush3.bf16.msra.mxu1 %v705_v61 }
  0xfa   : > { %v706_v4 = vpack.c.bf16 %v693_v63, %v692_v2  ;;  %v1463_v5 = vpop.f32.mrb[6].mxu0 }
  0xfb   : > { %v695_v6 = vmul.f32 %v1463_v5, %v2006_v54  ;;  %v559_v7 = vpop.f32.mrb[7].mxu0 }
  0xfc   : > { %v694_v8 = vmul.f32 %v2008_v57, %v559_v7  ;;  %1480 = vmatprep.subr.bf16.mxu1 %v706_v4 }
  0xfd   : > { %1481 = vmatpush3.bf16.msra.mxu1 %v706_v4 }
  0xfe   : > { %v707_v10 = vpack.c.bf16 %v695_v6, %v694_v8  ;;  %v1466_v11 = vpop.f32.mrb[8].mxu0 }
  0xff   : > { %v697_v13 = vmul.f32 %v1466_v11, %v2013_v1  ;;  %v569_v14 = vpop.f32.mrb[9].mxu0 }
 0x100   : > { %v696_v15 = vmul.f32 %v2016_v3, %v569_v14  ;;  %1482 = vmatprep.subr.bf16.mxu1 %v707_v10 }
 0x101   : > { %1483 = vmatpush3.bf16.msra.mxu1 %v707_v10 }
 0x102   : > { %v708_v16 = vpack.c.bf16 %v697_v13, %v696_v15  ;;  %v1469_v17 = vpop.f32.mrb[10].mxu0 }
 0x103   : > { %v699_v18 = vmul.f32 %v1469_v17, %v2020_v9  ;;  %v579_v19 = vpop.f32.mrb[11].mxu0 }
 0x104   : > { %v698_v21 = vmul.f32 %v2022_v12, %v579_v19  ;;  %1484 = vmatprep.subr.bf16.mxu1 %v708_v16 }
 0x105   : > { %1485 = vmatpush3.bf16.msra.mxu1 %v708_v16 }
 0x106   : > { %v709_v23 = vpack.c.bf16 %v699_v18, %v698_v21  ;;  %v1472_v24 = vpop.f32.mrb[12].mxu0 }
 0x107   : > { %v701_v25 = vmul.f32 %v1472_v24, %v2027_v20  ;;  %v589_v26 = vpop.f32.mrb[13].mxu0 }
 0x108   : > { %v700_v27 = vmul.f32 %v2030_v22, %v589_v26  ;;  %1486 = vmatprep.subr.bf16.mxu1 %v709_v23 }
 0x109   : > { %1487 = vmatpush3.bf16.msra.mxu1 %v709_v23 }
 0x10a   : > { %v710_v29 = vpack.c.bf16 %v701_v25, %v700_v27  ;;  %v1475_v30 = vpop.f32.mrb[14].mxu0 }
 0x10b   : > { %v703_v32 = vmul.f32 %v1475_v30, %v2034_v28  ;;  %v599_v33 = vpop.f32.mrb[15].mxu0 }
 0x10c   : > { %v702_v34 = vmul.f32 %v2036_v31, %v599_v33  ;;  %1488 = vmatprep.subr.bf16.mxu1 %v710_v29 }
 0x10d   : > { %1489 = vmatpush3.bf16.msra.mxu1 %v710_v29 }
 0x10e   : > { %v711_v42 = vpack.c.bf16 %v703_v32, %v702_v34 }
 0x110   : > { %1490 = vmatprep.subr.bf16.mxu1 %v711_v42 }
 0x111   : > { %1491 = vmatpush3.bf16.msra.mxu1 %v711_v42 }
 0x114   : > { %1493 = vmatmul.mubr.bf16.vlgmr.msra.gmra.mrb[0].mxu1 %v1960_v35  ;;  %v1096_v35 = vld [vmem:[%s2168_s6] sm:$0xff] }
 0x115   : > { %1496 = vmatprep.mubr.bf16.mxu1 %v1963_v36  ;;  %v1097_v36 = vld [vmem:[%s2168_s6 + $0x8] sm:$0xff] }
 0x118   : > { %v2047_v43 = vpop.f32.mrb[16].mxu0 }
 0x119   : > { %v996_v50 = vpop.f32.mrb[17].mxu0 }
 0x11c   : > { %1497 = vmatmul.mubr.bf16.gmra.mrb[4].mxu1 %v1967_v37  ;;  %v1649_v37 = vpack.c.bf16 %v1097_v36, %v1096_v35 }
 0x11d   : > { %1500 = vmatprep.mubr.bf16.mxu1 %v1971_v38 }
 0x11e   : > { %1650 = vmatprep.subr.bf16.mxu0 %v1649_v37 }
 0x11f   : > { %1652 = vmatpush3.bf16.msra.mxu0 %v1649_v37 }
 0x124   : > { %1501 = vmatmul.mubr.bf16.gmra.mrb[8].mxu1 %v1975_v39  ;;  %v2058_v39 = vld [vmem:[%s2167_s5] ss:$0 sm:$0xff] }
 0x125   : > { %1504 = vmatprep.mubr.bf16.mxu1 %v1979_v40 }
 0x12c   : > { %1505 = vmatmul.mubr.bf16.gmra.mrb[12].mxu1 %v1983_v41 }
 0x12d   : > { %1575 = vmatprep.mubr.f32.mxu1 %v996_v50 }
 0x1e7   : > { %v1494_v38 = vpop.f32.mrb[0].mxu1 }
 0x1e8   : > { %v859_v40 = vmul.f32 %v1494_v38, %v1992_v44  ;;  %v794_v41 = vpop.f32.mrb[1].mxu1 }
 0x1e9   : > { %v857_v51 = vmul.f32 %v794_v41, %v1994_v45  ;;  %v1495_v52 = vpop.f32.mrb[2].mxu1 }
 0x1ea   : > { %v882_v53 = vadd.f32 %v2058_v39, %v859_v40  ;;  %v860_v55 = vmul.f32 %v1495_v52, %v1996_v46  ;;  %v797_v56 = vpop.f32.mrb[3].mxu1 }
 0x1eb   : > { %v880_v58 = vadd.f32 %v2058_v39, %v857_v51  ;;  %v858_v59 = vmul.f32 %v797_v56, %v1998_v47 }
 0x1ec   : > { %v898_v60 = vmax.f32 %v882_v53, 0.0  ;;  %v883_v61 = vadd.f32 %v2058_v39, %v860_v55 }
 0x1ed   : > { %v896_v62 = vmax.f32 %v880_v58, 0.0  ;;  %v881_v63 = vadd.f32 %v2058_v39, %v858_v59 }
 0x1ee   : > { %v899_v0 = vmax.f32 %v883_v61, 0.0  ;;  %v1007_v5 = vmul.f32 %v898_v60, %v1992_v44 }
 0x1ef   : > { %v897_v2 = vmax.f32 %v881_v63, 0.0  ;;  %v1498_v4 = vpop.f32.mrb[4].mxu1  ;;  %v1005_v10 = vmul.f32 %v896_v62, %v1994_v45 }
 0x1f0   : > { %v1008_v6 = vmul.f32 %v899_v0, %v1996_v46  ;;  %v863_v7 = vmul.f32 %v1498_v4, %v2008_v57  ;;  %v810_v8 = vpop.f32.mrb[5].mxu1 }
 0x1f1   : > { %v1006_v11 = vmul.f32 %v897_v2, %v1998_v47  ;;  %v861_v13 = vmul.f32 %v810_v8, %v2002_v49  ;;  %v1499_v14 = vpop.f32.mrb[6].mxu1 }
 0x1f2   : > { %v886_v15 = vadd.f32 %v2058_v39, %v863_v7  ;;  %v864_v16 = vmul.f32 %v1499_v14, %v2006_v54  ;;  %v813_v17 = vpop.f32.mrb[7].mxu1  ;;  %v1621_v18 = vpack.c.bf16 %v1008_v6, %v1007_v5 }
 0x1f3   : > { %v884_v44 = vadd.f32 %v2058_v39, %v861_v13  ;;  %v862_v46 = vmul.f32 %v813_v17, %v2000_v48  ;;  %v1617_v19 = vpack.c.bf16 %v1006_v11, %v1005_v10 }
 0x1f4   : > { %v902_v21 = vmax.f32 %v886_v15, 0.0  ;;  %v887_v23 = vadd.f32 %v2058_v39, %v864_v16 }
 0x1f5   : > { %v900_v45 = vmax.f32 %v884_v44, 0.0  ;;  %v885_v47 = vadd.f32 %v2058_v39, %v862_v46  ;;  %1618 = vmatprep.subr.bf16.mxu1 %v1617_v19 }
 0x1f6   : > { %v903_v24 = vmax.f32 %v887_v23, 0.0  ;;  %1620 = vmatpush3.bf16.msra.mxu1 %v1617_v19  ;;  %v1011_v27 = vmul.f32 %v902_v21, %v2008_v57 }
 0x1f7   : > { %v901_v25 = vmax.f32 %v885_v47, 0.0  ;;  %v1502_v26 = vpop.f32.mrb[8].mxu1  ;;  %1622 = vmatprep.subr.bf16.mxu1 %v1621_v18  ;;  %v1009_v33 = vmul.f32 %v900_v45, %v2002_v49 }
 0x1f8   : > { %v1012_v29 = vmul.f32 %v903_v24, %v2006_v54  ;;  %v867_v30 = vmul.f32 %v1502_v26, %v2022_v12  ;;  %v826_v32 = vpop.f32.mrb[9].mxu1 }
 0x1f9   : > { %v1010_v34 = vmul.f32 %v901_v25, %v2000_v48  ;;  %v865_v42 = vmul.f32 %v826_v32, %v2016_v3  ;;  %v1503_v50 = vpop.f32.mrb[10].mxu1 }
 0x1fa   : > { %v890_v35 = vadd.f32 %v2058_v39, %v867_v30  ;;  %v868_v36 = vmul.f32 %v1503_v50, %v2020_v9  ;;  %v829_v37 = vpop.f32.mrb[11].mxu1  ;;  %1624 = vmatpush3.bf16.msra.mxu1 %v1621_v18  ;;  %v1629_v38 = vpack.c.bf16 %v1012_v29, %v1011_v27 }
 0x1fb   : > { %v888_v57 = vadd.f32 %v2058_v39, %v865_v42  ;;  %v866_v54 = vmul.f32 %v829_v37, %v2013_v1  ;;  %v1625_v40 = vpack.c.bf16 %v1010_v34, %v1009_v33 }
 0x1fc   : > { %v906_v41 = vmax.f32 %v890_v35, 0.0  ;;  %v891_v49 = vadd.f32 %v2058_v39, %v868_v36 }
 0x1fd   : > { %v904_v51 = vmax.f32 %v888_v57, 0.0  ;;  %v889_v48 = vadd.f32 %v2058_v39, %v866_v54  ;;  %1626 = vmatprep.subr.bf16.mxu1 %v1625_v40 }
 0x1fe   : > { %v907_v52 = vmax.f32 %v891_v49, 0.0  ;;  %1628 = vmatpush3.bf16.msra.mxu1 %v1625_v40  ;;  %v1015_v56 = vmul.f32 %v906_v41, %v2022_v12 }
 0x1ff   : > { %v905_v53 = vmax.f32 %v889_v48, 0.0  ;;  %v1506_v55 = vpop.f32.mrb[12].mxu1  ;;  %1630 = vmatprep.subr.bf16.mxu1 %v1629_v38  ;;  %v1013_v61 = vmul.f32 %v904_v51, %v2016_v3 }
 0x200   : > { %v1016_v58 = vmul.f32 %v907_v52, %v2020_v9  ;;  %v871_v59 = vmul.f32 %v1506_v55, %v2036_v31  ;;  %v842_v60 = vpop.f32.mrb[13].mxu1 }
 0x201   : > { %v1014_v62 = vmul.f32 %v905_v53, %v2013_v1  ;;  %v869_v63 = vmul.f32 %v842_v60, %v2030_v22  ;;  %v1507_v0 = vpop.f32.mrb[14].mxu1 }
 0x202   : > { %v894_v2 = vadd.f32 %v2058_v39, %v871_v59  ;;  %v872_v4 = vmul.f32 %v1507_v0, %v2034_v28  ;;  %v845_v5 = vpop.f32.mrb[15].mxu1  ;;  %1632 = vmatpush3.bf16.msra.mxu1 %v1629_v38  ;;  %v1637_v6 = vpack.c.bf16 %v1016_v58, %v1015_v56 }
 0x203   : > { %v892_v12 = vadd.f32 %v2058_v39, %v869_v63  ;;  %v870_v9 = vmul.f32 %v845_v5, %v2027_v20  ;;  %v1633_v7 = vpack.c.bf16 %v1014_v62, %v1013_v61 }
 0x204   : > { %v910_v8 = vmax.f32 %v894_v2, 0.0  ;;  %v895_v3 = vadd.f32 %v2058_v39, %v872_v4 }
 0x205   : > { %v908_v10 = vmax.f32 %v892_v12, 0.0  ;;  %v893_v1 = vadd.f32 %v2058_v39, %v870_v9  ;;  %1634 = vmatprep.subr.bf16.mxu1 %v1633_v7 }
 0x206   : > { %v911_v11 = vmax.f32 %v895_v3, 0.0  ;;  %1636 = vmatpush3.bf16.msra.mxu1 %v1633_v7  ;;  %v1019_v14 = vmul.f32 %v910_v8, %v2036_v31  ;;  %v1187_v31 = vlaneseq }
 0x207   : > { %v909_v13 = vmax.f32 %v893_v1, 0.0  ;;  %1638 = vmatprep.subr.bf16.mxu1 %v1637_v6  ;;  %v1017_v16 = vmul.f32 %v908_v10, %v2030_v22 }
 0x208   : > { %v1020_v15 = vmul.f32 %v911_v11, %v2034_v28  ;;  %v1188_v28 = vand.u32 127, %v1187_v31 }
 0x209   : > { %v1018_v17 = vmul.f32 %v909_v13, %v2027_v20  ;;  %v1364_v20 = vld [vmem:[%s2169_s7] ss:$0 sm:$0xff] }
 0x20a   : > { %1640 = vmatpush3.bf16.msra.mxu1 %v1637_v6  ;;  %v1645_v18 = vpack.c.bf16 %v1020_v15, %v1019_v14  ;;  %vm1189_vm2 = vcmp.lt.s32.totalorder %v1188_v28, 4 }
 0x20b   : > { %v1641_v44 = vpack.c.bf16 %v1018_v17, %v1017_v16 }
 0x20d   : > { %1642 = vmatprep.subr.bf16.mxu1 %v1641_v44 }
 0x20e   : > { %1644 = vmatpush3.bf16.msra.mxu1 %v1641_v44 }
 0x20f   : > { %1646 = vmatprep.subr.bf16.mxu1 %v1645_v18 }
 0x212   : > { %1648 = vmatpush3.bf16.msra.mxu1 %v1645_v18 }
 0x215   : > { %1576 = vmatmul.mubr.f32.vlgmr.msra.gmra.mrb[16].mxu1 %v2047_v43 }
 0x2e8   : > { %v1577_v39 = vpop.f32.mrb[16].mxu1 }
 0x2e9   : > { %v1087_v46 = vpop.f32.mrb[17].mxu1 }
 0x2ea   : > { %1582 = vmatprep.mubr.msk.f32.mxu0 %vm1105_vm1, %v1087_v46 }
 0x2eb   : > { %1583 = vmatmul.mubr.msk.f32.vlgmr.msra.gmra.mrb[18].mxu0 %vm1105_vm1, %v1577_v39 }
 0x3be   : > { %v1584_v22 = vpop.f32.mrb[18].mxu0 }
 0x3bf   : > { %v1184_v19 = vadd.f32 %v1584_v22, %v1364_v20  ;;  %v1178_v21 = vpop.f32.mrb[19].mxu0 }
 0x3c0   : > { %v1179_v23 = vadd.f32 %v1364_v20, %v1178_v21 }
 0x3c1   : > { %v1191_v45 = vsel %vm1189_vm2, %v1184_v19, -1e+30 }
 0x3c2   : > { %1194 = vmax.xlane.f32.xlu1 %v1191_v45  ;;  %v1190_v47 = vsel %vm1189_vm2, %v1179_v23, -1e+30 }
 0x3c3   : > { %1192 = vmax.xlane.f32.xlu0 %v1190_v47 }
 0x44f   : > { %v1195_v43 = vpop.xlane.xlu1 %1194 }
 0x450   : > { %v1193_v24 = vpop.xlane.xlu0 %1192  ;;  %v1197_v25 = vsub.f32 %v1191_v45, %v1195_v43 }
 0x451   : > { %v1196_v26 = vsub.f32 %v1190_v47, %v1193_v24 }
 0x452   : > { %v1200_v29 = vmul.f32 1.442695, %v1197_v25 }
 0x453   : > { %v1198_v27 = vmul.f32 1.442695, %v1196_v26 }
 0x455   : > { %1721 = vpow2.f32 %v1198_v27 }
 0x456   : > { %1723 = vpow2.f32 %v1200_v29 }
 0x45f   : > { %v1722_v30 = vpop.eup %1721 }
 0x460   : > { %1202 = vadd.xlane.f32.xlu0 %v1722_v30  ;;  %v1724_v32 = vpop.eup %1723 }
 0x464   : > { %1204 = vadd.xlane.f32.xlu0 %v1724_v32 }
 0x4ed   : > { %v1203_v33 = vpop.xlane.xlu0 %1202 }
 0x4ee   : > { %1725 = vlog2.f32 %v1203_v33 }
 0x4f1   : > { %v1205_v34 = vpop.xlane.xlu0 %1204 }
 0x4f2   : > { %1727 = vlog2.f32 %v1205_v34 }
 0x4f8   : > { %v1726_v42 = vpop.eup %1725 }
 0x4f9   : > { %v1207_v50 = vmul.f32 0.6931472, %v1726_v42 }
 0x4fb   : > { %v1210_v35 = vsub.f32 %v1196_v26, %v1207_v50 }
 0x4fc   : > { %v1728_v36 = vpop.eup %1727 }
 0x4fd   : > { %1212 = vst [vmem:[%s343_s20] sm:$0xff] %v1210_v35  ;;  %v1209_v37 = vmul.f32 0.6931472, %v1728_v36 }
 0x4ff   : > { %v1211_v38 = vsub.f32 %v1197_v25, %v1209_v37 }
 0x501   : > { %1213 = vst [vmem:[%s343_s20 + $0x8] sm:$0xff] %v1211_v38 }
 0x502   : > { %1742 = shalt.err (!%p1739_p3)
}
 0x503   : > { %s1743_s13 = scalar_lea.hbm %s2117_s24, 256  ;;  %s1747_s20 = scalar_lea.hbm %s2170_s8, 512 }
 0x504   : > { %p1744_p4 = scmp.ne.s32.totalorder %s2117_s24, %s1743_s13  ;;  %p1748_p9 = scmp.lt.u32.totalorder %s2117_s24, %s2170_s8 }
 0x505   : > { %p1749_p10 = scmp.lt.u32.totalorder %s1747_s20, %s1743_s13  ;;  %p1751_p12 = scmp.lt.u32.totalorder %s1743_s13, %s2117_s24 }
 0x506   : > { %p1745_p7 = pnand %p1744_p4, %p1880_p5 }
 0x507   : > { %p1750_p11 = por %p1749_p10, %p1748_p9 }
 0x508   : > { %p1746_p8 = pneg %p1745_p7 }
 0x509   : > { %p1752_p13 = por %p1751_p12, %p1750_p11 }
 0x50b   : > { %p1753_p0 = pnand %p1752_p13, %p1746_p8 }
 0x50d   : > { %1756 = shalt.err (!%p1753_p0)
}
 0x50e   : > { %s1795_s23 = smov 128   ;;  %s1796_s26 = smov 8  }
 0x50f   : > { %1669 = dma.vmem_to_hbm [thread:$0]  (%p1880_p5), %s2119_s21, 256, %s2117_s24, %s2121_s25, %s1795_s23, %s1795_s23, %s1796_s26  }
 0x510 PF: > { %p1675_p1 = scmp.ge.s32.totalorder %s1791_s30, 2  ;;  %s1243_s9 = sand.u32 1, %s1779_s27  }
 0x511   : > { %s1244_s10 = scalar_lea.sflag [#allocation3], %s1243_s9 }
 0x512   : > { %p1672_p2 = pnand %p1675_p1, %p1884_p6 }
 0x514   : > { %1774 = dma.done.wait (!%p1672_p2), %s1244_s10, 256  }
 0x515   : > { %1776 = vsyncadd (!%p1672_p2), %s1244_s10, 4294967040  ;;  %p18_p3 = scmp.ge.s32.totalorder %s1867_s11, 4   ;;  %s2173_s27 = smov %s1783_s28 }
 0x516   : > { %s2174_s28 = smov %s1787_s29  ;;  %s2175_s29 = smov %s1878_s14 }
 0x517   : > { %s2176_s30 = smov %s1867_s11  ;;  %20 = sbr.rel (!%p18_p3) target bundleno = 3 (0x3), region = 96 }
 0x51e   :  { %1249 = vsyncpa [#allocation3], 1 }
 0x51f   :  { %1251 = vsyncpa [#allocation3 + $0x1], 1 }

</bundles_post_ra>
